<compile_context>
chip_gen: v7x
topology: tpu7x:2x2x1
jax: 0.10.0
libtpu: 0.0.40
codegen_flags: <defaults>
</compile_context>

<pallas_src>
import functools

import jax
import jax.numpy as jnp
from jax import lax
from jax.experimental import pallas as pl
from jax.experimental.pallas import tpu as pltpu

PACK = 128  # lane-dense packed output width (feats | head | zero pad)


# ---------------------------------------------------------------------------
# Single fused kernel: backbone (conv + ReLU + pool) + head (MLP)
# ---------------------------------------------------------------------------
def contrastive_kernel(patch_ref, wconv_ref, bconv_ref, pool_ref,
                       w1_ref, b1_ref, wf_ref, w2p_ref, b2p_ref, out_ref):
    # patch_ref: (B*HW, Cin*9)   im2col patches, batch collapsed into rows
    # wconv_ref: (Cin*9, Cf)     flattened conv weight
    # bconv_ref: (1, Cf)         conv bias
    # pool_ref:  (B, B*HW)       block-diagonal averaging matrix (1/HW entries)
    # w1_ref:    (Cf, Hdim), b1_ref: (1, Hdim)
    # wf_ref:    (Cf, 128)       identity placed in lanes [0:Cf]      -> copies feats
    # w2p_ref:   (Hdim, 128)     w2 placed in lanes [Cf:Cf+E]         -> head output
    # b2p_ref:   (1, 128)        b2 placed in lanes [Cf:Cf+E]
    # out_ref:   (B, 128)        packed [feats | head | 0]
    y = jnp.dot(patch_ref[...], wconv_ref[...],
                preferred_element_type=jnp.float32)            # (B*HW, Cf)
    y = jnp.maximum(y + bconv_ref[...], 0.0)                   # conv bias + ReLU

    # Global average pool as an MXU matmul (segmented mean per batch element).
    feats = jnp.dot(pool_ref[...], y,
                    preferred_element_type=jnp.float32)        # (B, Cf)

    # Head: Linear -> ReLU -> Linear (second linear pre-packed to 128 lanes).
    h = jnp.dot(feats, w1_ref[...],
                preferred_element_type=jnp.float32) + b1_ref[...]
    h = jnp.maximum(h, 0.0)                                    # (B, Hdim)

    packed = jnp.dot(feats, wf_ref[...],
                     preferred_element_type=jnp.float32)       # feats -> lanes [0:Cf]
    packed = packed + jnp.dot(h, w2p_ref[...],
                              preferred_element_type=jnp.float32)
    out_ref[...] = packed + b2p_ref[...]                       # one dense (B,128) store


def _fused_forward_pallas(patches, p):
    B = p["pool"].shape[0]
    vmem = pltpu.MemorySpace.VMEM
    return pl.pallas_call(
        contrastive_kernel,
        out_shape=jax.ShapeDtypeStruct((B, PACK), jnp.float32),
        in_specs=[pl.BlockSpec(memory_space=vmem)] * 9,
        out_specs=pl.BlockSpec(memory_space=vmem),
    )(patches, p["w_flat"], p["b_conv"], p["pool"],
      p["w1"], p["b1"], p["wf"], p["w2p"], p["b2p"])


# ---------------------------------------------------------------------------
# Wrapper-side layout plumbing (fused by jit into one patches fusion)
# ---------------------------------------------------------------------------
def im2col_3x3_same(x_nchw):
    """(B, C, H, W) -> (B*H*W, C*9) patches, (c, kh, kw) minor ordering."""
    B, C, H, W = x_nchw.shape
    xp = jnp.pad(x_nchw, ((0, 0), (0, 0), (1, 1), (1, 1)))
    cols = [xp[:, :, kh:kh + H, kw:kw + W] for kh in range(3) for kw in range(3)]
    p = jnp.stack(cols, axis=2)                  # (B, C, 9, H, W)
    p = p.reshape(B, C * 9, H, W)                # channel-major, then (kh, kw)
    p = jnp.transpose(p, (0, 2, 3, 1))           # (B, H, W, C*9)
    return p.reshape(B * H * W, C * 9)


def prepare_params(params, B, H, W):
    """Precompute all kernel-side constant matrices once (not per forward)."""
    w_conv = params["w_conv"]                    # (Cf, Cin, 3, 3)
    Cf = w_conv.shape[0]
    Hdim = params["w1"].shape[1]
    E = params["w2"].shape[1]
    HW = H * W

    w_flat = w_conv.reshape(Cf, -1).T            # (Cin*9, Cf), matches patch order
    b_conv = params["b_conv"].reshape(1, Cf)

    # Block-diagonal averaging matrix: row b has 1/HW over that batch's rows.
    pool = jnp.kron(jnp.eye(B, dtype=jnp.float32),
                    jnp.full((1, HW), 1.0 / HW, dtype=jnp.float32))   # (B, B*HW)

    # Lane-dense packing matrices for the final (B, 128) store.
    wf = jnp.zeros((Cf, PACK), jnp.float32).at[:, :Cf].set(
        jnp.eye(Cf, dtype=jnp.float32))
    w2p = jnp.zeros((Hdim, PACK), jnp.float32).at[:, Cf:Cf + E].set(params["w2"])
    b2p = jnp.zeros((1, PACK), jnp.float32).at[:, Cf:Cf + E].set(
        params["b2"].reshape(1, E))

    return {
        "w_flat": w_flat, "b_conv": b_conv, "pool": pool,
        "w1": params["w1"], "b1": params["b1"].reshape(1, Hdim),
        "wf": wf, "w2p": w2p, "b2p": b2p,
    }


@functools.partial(jax.jit, static_argnums=(2, 3))
def contrastive_forward(x, prepped, cf, e):
    """Equivalent of Contrastive.forward: returns {'backbone', 'head'}."""
    patches = im2col_3x3_same(x)                 # (B*HW, Cin*9)
    packed = _fused_forward_pallas(patches, prepped)   # (B, 128)
    feats = packed[:, :cf]
    emb = packed[:, cf:cf + e]
    return {"backbone": feats, "head": emb}


# ---------------------------------------------------------------------------
# Pure-JAX reference (matches PyTorch conv/linear semantics)
# ---------------------------------------------------------------------------
def reference_forward(x, params):
    y = lax.conv_general_dilated(
        x, params["w_conv"], window_strides=(1, 1), padding="SAME",
        dimension_numbers=("NCHW", "OIHW", "NCHW"))
    y = jax.nn.relu(y + params["b_conv"].reshape(1, -1, 1, 1))
    feats = jnp.mean(y, axis=(2, 3))
    h = jax.nn.relu(feats @ params["w1"] + params["b1"])
    emb = h @ params["w2"] + params["b2"]
    return {"backbone": feats, "head": emb}


if __name__ == "__main__":
    B, Cin, H, W = 2, 4, 16, 16
    Cf, Hdim, E = 8, 32, 16

    key = jax.random.PRNGKey(0)
    k = jax.random.split(key, 6)
    x = jax.random.normal(k[0], (B, Cin, H, W), dtype=jnp.float32)
    params = {
        "w_conv": 0.1 * jax.random.normal(k[1], (Cf, Cin, 3, 3), jnp.float32),
        "b_conv": 0.1 * jax.random.normal(k[2], (Cf,), jnp.float32),
        "w1": 0.1 * jax.random.normal(k[3], (Cf, Hdim), jnp.float32),
        "b1": jnp.zeros((Hdim,), jnp.float32),
        "w2": 0.1 * jax.random.normal(k[4], (Hdim, E), jnp.float32),
        "b2": jnp.zeros((E,), jnp.float32),
    }

    prepped = prepare_params(params, B, H, W)

    out = jax.block_until_ready(contrastive_forward(x, prepped, Cf, E))
    ref = jax.block_until_ready(reference_forward(x, params))

    assert out["backbone"].shape == (B, Cf)
    assert out["head"].shape == (B, E)
    assert jnp.allclose(out["backbone"], ref["backbone"], rtol=1e-4, atol=1e-4)
    assert jnp.allclose(out["head"], ref["head"], rtol=1e-4, atol=1e-4)

    print("KERNEL_OK")
</pallas_src>

<mosaic_0001>
module attributes {stable_mosaic.version = 11 : i64} {
  func.func @contrastive_kernel(%arg0: memref<512x36xf32, #tpu.memory_space<vmem>>, %arg1: memref<36x8xf32, #tpu.memory_space<vmem>>, %arg2: memref<1x8xf32, #tpu.memory_space<vmem>>, %arg3: memref<2x512xf32, #tpu.memory_space<vmem>>, %arg4: memref<8x32xf32, #tpu.memory_space<vmem>>, %arg5: memref<1x32xf32, #tpu.memory_space<vmem>>, %arg6: memref<8x128xf32, #tpu.memory_space<vmem>>, %arg7: memref<32x128xf32, #tpu.memory_space<vmem>>, %arg8: memref<1x128xf32, #tpu.memory_space<vmem>>, %arg9: memref<2x128xf32, #tpu.memory_space<vmem>>) attributes {dimension_semantics = [], scalar_prefetch = 0 : i64, scratch_operands = 0 : i64, tpu.core_type = #tpu.core_type<tc>} {
    %c0 = arith.constant 0 : index
    %c0_0 = arith.constant 0 : index
    %0 = vector.load %arg0[%c0, %c0_0] : memref<512x36xf32, #tpu.memory_space<vmem>>, vector<512x36xf32>
    %c0_1 = arith.constant 0 : index
    %c0_2 = arith.constant 0 : index
    %1 = vector.load %arg1[%c0_1, %c0_2] : memref<36x8xf32, #tpu.memory_space<vmem>>, vector<36x8xf32>
    %cst = arith.constant dense<0.000000e+00> : vector<512x8xf32>
    %2 = tpu.matmul %0, %1, %cst {dimension_numbers = #tpu.dot_dimension_numbers<[1], [0], [0], [1], [0, 0, 1, 1], [], []>} : vector<512x36xf32>, vector<36x8xf32>, vector<512x8xf32> -> vector<512x8xf32>
    %c0_3 = arith.constant 0 : index
    %c0_4 = arith.constant 0 : index
    %3 = vector.load %arg2[%c0_3, %c0_4] : memref<1x8xf32, #tpu.memory_space<vmem>>, vector<1x8xf32>
    %4 = vector.broadcast %3 : vector<1x8xf32> to vector<512x8xf32>
    %5 = arith.addf %2, %4 : vector<512x8xf32>
    %cst_5 = arith.constant 0.000000e+00 : f32
    %6 = vector.broadcast %cst_5 : f32 to vector<512x8xf32>
    %7 = arith.maximumf %5, %6 : vector<512x8xf32>
    %c0_6 = arith.constant 0 : index
    %c0_7 = arith.constant 0 : index
    %8 = vector.load %arg3[%c0_6, %c0_7] : memref<2x512xf32, #tpu.memory_space<vmem>>, vector<2x512xf32>
    %cst_8 = arith.constant dense<0.000000e+00> : vector<2x8xf32>
    %9 = tpu.matmul %8, %7, %cst_8 {dimension_numbers = #tpu.dot_dimension_numbers<[1], [0], [0], [1], [0, 0, 1, 1], [], []>} : vector<2x512xf32>, vector<512x8xf32>, vector<2x8xf32> -> vector<2x8xf32>
    %c0_9 = arith.constant 0 : index
    %c0_10 = arith.constant 0 : index
    %10 = vector.load %arg4[%c0_9, %c0_10] : memref<8x32xf32, #tpu.memory_space<vmem>>, vector<8x32xf32>
    %cst_11 = arith.constant dense<0.000000e+00> : vector<2x32xf32>
    %11 = tpu.matmul %9, %10, %cst_11 {dimension_numbers = #tpu.dot_dimension_numbers<[1], [0], [0], [1], [0, 0, 1, 1], [], []>} : vector<2x8xf32>, vector<8x32xf32>, vector<2x32xf32> -> vector<2x32xf32>
    %c0_12 = arith.constant 0 : index
    %c0_13 = arith.constant 0 : index
    %12 = vector.load %arg5[%c0_12, %c0_13] : memref<1x32xf32, #tpu.memory_space<vmem>>, vector<1x32xf32>
    %13 = vector.broadcast %12 : vector<1x32xf32> to vector<2x32xf32>
    %14 = arith.addf %11, %13 : vector<2x32xf32>
    %cst_14 = arith.constant 0.000000e+00 : f32
    %15 = vector.broadcast %cst_14 : f32 to vector<2x32xf32>
    %16 = arith.maximumf %14, %15 : vector<2x32xf32>
    %c0_15 = arith.constant 0 : index
    %c0_16 = arith.constant 0 : index
    %17 = vector.load %arg6[%c0_15, %c0_16] : memref<8x128xf32, #tpu.memory_space<vmem>>, vector<8x128xf32>
    %cst_17 = arith.constant dense<0.000000e+00> : vector<2x128xf32>
    %18 = tpu.matmul %9, %17, %cst_17 {dimension_numbers = #tpu.dot_dimension_numbers<[1], [0], [0], [1], [0, 0, 1, 1], [], []>} : vector<2x8xf32>, vector<8x128xf32>, vector<2x128xf32> -> vector<2x128xf32>
    %c0_18 = arith.constant 0 : index
    %c0_19 = arith.constant 0 : index
    %19 = vector.load %arg7[%c0_18, %c0_19] : memref<32x128xf32, #tpu.memory_space<vmem>>, vector<32x128xf32>
    %cst_20 = arith.constant dense<0.000000e+00> : vector<2x128xf32>
    %20 = tpu.matmul %16, %19, %cst_20 {dimension_numbers = #tpu.dot_dimension_numbers<[1], [0], [0], [1], [0, 0, 1, 1], [], []>} : vector<2x32xf32>, vector<32x128xf32>, vector<2x128xf32> -> vector<2x128xf32>
    %21 = arith.addf %18, %20 : vector<2x128xf32>
    %c0_21 = arith.constant 0 : index
    %c0_22 = arith.constant 0 : index
    %22 = vector.load %arg8[%c0_21, %c0_22] : memref<1x128xf32, #tpu.memory_space<vmem>>, vector<1x128xf32>
    %23 = vector.broadcast %22 : vector<1x128xf32> to vector<2x128xf32>
    %24 = arith.addf %21, %23 : vector<2x128xf32>
    %c0_23 = arith.constant 0 : index
    %c0_24 = arith.constant 0 : index
    %25 = vector.load %arg9[%c0_23, %c0_24] : memref<2x128xf32, #tpu.memory_space<vmem>>, vector<2x128xf32>
    tpu.vector_store %arg9[%c0_23, %c0_24], %24 {strides = array<i32>} : memref<2x128xf32, #tpu.memory_space<vmem>>, vector<2x128xf32>,
    return
  }
}

</mosaic_0001>

<bundles_post_ra>
// kernel: contrastive_forward.1
= control target key start
LH: loop header
LB: loop body
LE: loop exit
PB: predicated region body
PF: predicated region fallthrough
CT: control target
= control target key end

     0   :  { %vm108_vm0 = vcmask 293888   ;;  %vm301_vm1 = vcmask 1043456   ;;  %vm1599_vm2 = vmmov 0   ;;  %vm925_vm3 = vcmask 64512   ;;  %s2087_s1 = inlined_call_operand.vmem [shape: f32[36,8], index: 1, kind: input, shape index: {}]   ;;  %s2088_s0 = inlined_call_operand.vmem [shape: f32[512,36], index: 0, kind: input, shape index: {}]   ;;  %s2089_s3 = inlined_call_operand.vmem [shape: f32[2,512], index: 3, kind: input, shape index: {}]   ;;  %s2090_s2 = inlined_call_operand.vmem [shape: f32[1,8], index: 2, kind: input, shape index: {}]   ;;  %s2091_s4 = inlined_call_operand.vmem [shape: f32[8,32], index: 4, kind: input, shape index: {}]   ;;  %s2092_s7 = inlined_call_operand.vmem [shape: f32[32,128], index: 7, kind: input, shape index: {}]   ;;  %s2093_s5 = inlined_call_operand.vmem [shape: f32[1,32], index: 5, kind: input, shape index: {}]   ;;  %s2094_s6 = inlined_call_operand.vmem [shape: f32[8,128], index: 6, kind: input, shape index: {}]   ;;  %s2095_s8 = inlined_call_operand.vmem [shape: f32[1,128], index: 8, kind: input, shape index: {}]   ;;  %s2096_s9 = inlined_call_operand.vmem [shape: f32[2,128], index: 9, kind: output, shape index: {}]  }
   0x1   :  { %v96_v0 = vld [vmem:[%s2087_s1] sm:$0xff]  ;;  %v97_v1 = vld [vmem:[%s2087_s1 + $0x8] sm:$0xff]  ;;  %v98_v2 = vld [vmem:[%s2087_s1 + $0x10] sm:$0xff]  ;;  %vm1005_vm4 = vcmask 261120  }
   0x2   :  { %v1508_v3 = vpack.c.bf16 %v97_v1, %v96_v0  ;;  %v99_v4 = vld [vmem:[%s2087_s1 + $0x18] sm:$0xff]  ;;  %v32_v5 = vld [vmem:[%s2088_s0] sm:$0xff]  ;;  %v33_v8 = vld [vmem:[%s2088_s0 + $0x8] sm:$0xff] }
   0x3   :  { %v1512_v6 = vpack.c.bf16 %v99_v4, %v98_v2  ;;  %1391 = vmatprep.mubr.msk.f32.mxu0 %vm108_vm0, %v32_v5  ;;  %v100_v7 = vld [vmem:[%s2087_s1 + $0x20] sm:$0xf]  ;;  %v34_v9 = vld [vmem:[%s2088_s0 + $0x10] sm:$0xff]  ;;  %v79_v11 = vld [vmem:[%s2088_s0 + $0x178] sm:$0xff] }
   0x4   :  { %1509 = vmatprep.subr.bf16.mxu0 %v1508_v3  ;;  %1586 = vmatprep.subr.bf16.mxu1 %v1508_v3  ;;  %v78_v10 = vld [vmem:[%s2088_s0 + $0x170] sm:$0xff]  ;;  %v80_v12 = vld [vmem:[%s2088_s0 + $0x180] sm:$0xff]  ;;  %v35_v13 = vld [vmem:[%s2088_s0 + $0x18] sm:$0xff] }
   0x5   :  { %1511 = vmatpush3.bf16.msra.mxu0 %v1508_v3  ;;  %1589 = vmatpush3.bf16.msra.mxu1 %v1508_v3  ;;  %v36_v14 = vld [vmem:[%s2088_s0 + $0x20] sm:$0xff]  ;;  %v81_v15 = vld [vmem:[%s2088_s0 + $0x188] sm:$0xff]  ;;  %v82_v16 = vld [vmem:[%s2088_s0 + $0x190] sm:$0xff] }
   0x6   :  { %1513 = vmatprep.subr.bf16.mxu0 %v1512_v6  ;;  %1587 = vmatprep.subr.bf16.mxu1 %v1512_v6  ;;  %v37_v17 = vld [vmem:[%s2088_s0 + $0x28] sm:$0xff]  ;;  %v38_v18 = vld [vmem:[%s2088_s0 + $0x30] sm:$0xff]  ;;  %v83_v19 = vld [vmem:[%s2088_s0 + $0x198] sm:$0xff] }
   0x7   :  { %1460 = vmatprep.mubr.msk.f32.mxu1 %vm108_vm0, %v78_v10  ;;  %v84_v20 = vld [vmem:[%s2088_s0 + $0x1a0] sm:$0xff]  ;;  %v39_v21 = vld [vmem:[%s2088_s0 + $0x38] sm:$0xff]  ;;  %v85_v23 = vld [vmem:[%s2088_s0 + $0x1a8] sm:$0xff] }
   0x8   :  { %v40_v22 = vld [vmem:[%s2088_s0 + $0x40] sm:$0xff]  ;;  %v86_v24 = vld [vmem:[%s2088_s0 + $0x1b0] sm:$0xff]  ;;  %v41_v25 = vld [vmem:[%s2088_s0 + $0x48] sm:$0xff] }
   0x9   :  { %1515 = vmatpush3.bf16.msra.mxu0 %v1512_v6  ;;  %1590 = vmatpush3.bf16.msra.mxu1 %v1512_v6  ;;  %v42_v26 = vld [vmem:[%s2088_s0 + $0x50] sm:$0xff]  ;;  %v87_v27 = vld [vmem:[%s2088_s0 + $0x1b8] sm:$0xff]  ;;  %v88_v28 = vld [vmem:[%s2088_s0 + $0x1c0] sm:$0xff] }
   0xa   :  { %1389 = vmatprep.subr.msk.mxu0 %vm301_vm1, %v100_v7  ;;  %1588 = vmatprep.subr.msk.mxu1 %vm301_vm1, %v100_v7  ;;  %v43_v29 = vld [vmem:[%s2088_s0 + $0x58] sm:$0xff]  ;;  %v44_v30 = vld [vmem:[%s2088_s0 + $0x60] sm:$0xff]  ;;  %v89_v31 = vld [vmem:[%s2088_s0 + $0x1c8] sm:$0xff] }
   0xb   :  { %v90_v32 = vld [vmem:[%s2088_s0 + $0x1d0] sm:$0xff]  ;;  %v45_v33 = vld [vmem:[%s2088_s0 + $0x68] sm:$0xff]  ;;  %v91_v35 = vld [vmem:[%s2088_s0 + $0x1d8] sm:$0xff] }
   0xc   :  { %v46_v34 = vld [vmem:[%s2088_s0 + $0x70] sm:$0xff]  ;;  %v92_v36 = vld [vmem:[%s2088_s0 + $0x1e0] sm:$0xff]  ;;  %v47_v37 = vld [vmem:[%s2088_s0 + $0x78] sm:$0xff] }
   0xd   :  { %1390 = vmatpush3.msk.msra.mxu0 %vm301_vm1, %v100_v7  ;;  %1591 = vmatpush3.msk.msra.mxu1 %vm301_vm1, %v100_v7  ;;  %v48_v38 = vld [vmem:[%s2088_s0 + $0x80] sm:$0xff]  ;;  %v93_v39 = vld [vmem:[%s2088_s0 + $0x1e8] sm:$0xff]  ;;  %v94_v40 = vld [vmem:[%s2088_s0 + $0x1f0] sm:$0xff]  ;;  %v1597_v7 = vmov 1983009808  }
   0xe   :  { %1392 = vmatmul.mubr.msk.f32.vlgmr.msra.gmra.mrb[0].mxu0 %vm108_vm0, %v33_v8  ;;  %1461 = vmatmul.mubr.msk.f32.vlgmr.msra.gmra.mrb[0].mxu1 %vm108_vm0, %v79_v11  ;;  %v49_v41 = vld [vmem:[%s2088_s0 + $0x88] sm:$0xff]  ;;  %v50_v42 = vld [vmem:[%s2088_s0 + $0x90] sm:$0xff]  ;;  %v95_v43 = vld [vmem:[%s2088_s0 + $0x1f8] sm:$0xff]  ;;  %v758_v8 = vunpack.c.l.s4 %v1597_v7 }
   0xf   :  { %1394 = vmatprep.mubr.msk.f32.mxu0 %vm108_vm0, %v34_v9  ;;  %1463 = vmatprep.mubr.msk.f32.mxu1 %vm108_vm0, %v80_v12  ;;  %v51_v44 = vld [vmem:[%s2088_s0 + $0x98] sm:$0xff]  ;;  %v52_v45 = vld [vmem:[%s2088_s0 + $0xa0] sm:$0xff]  ;;  %v53_v46 = vld [vmem:[%s2088_s0 + $0xa8] sm:$0xff]  ;;  %v760_v9 = vlaneseq }
  0x10   :  { %v54_v47 = vld [vmem:[%s2088_s0 + $0xb0] sm:$0xff]  ;;  %v55_v48 = vld [vmem:[%s2088_s0 + $0xb8] sm:$0xff]  ;;  %v56_v49 = vld [vmem:[%s2088_s0 + $0xc0] sm:$0xff]  ;;  %v759_v10 = vunpack.c.0.s8 %v758_v8 }
  0x11   :  { %v57_v50 = vld [vmem:[%s2088_s0 + $0xc8] sm:$0xff]  ;;  %v58_v51 = vld [vmem:[%s2088_s0 + $0xd0] sm:$0xff]  ;;  %v59_v52 = vld [vmem:[%s2088_s0 + $0xd8] sm:$0xff]  ;;  %v761_v11 = vshrl.u32 %v760_v9, 7 }
  0x12   :  { %1395 = vmatmul.mubr.msk.f32.gmra.mrb[2].mxu0 %vm108_vm0, %v35_v13  ;;  %1464 = vmatmul.mubr.msk.f32.gmra.mrb[2].mxu1 %vm108_vm0, %v81_v15  ;;  %v60_v53 = vld [vmem:[%s2088_s0 + $0xe0] sm:$0xff]  ;;  %v61_v54 = vld [vmem:[%s2088_s0 + $0xe8] sm:$0xff]  ;;  %v62_v55 = vld [vmem:[%s2088_s0 + $0xf0] sm:$0xff] }
  0x13   :  { %1397 = vmatprep.mubr.msk.f32.mxu0 %vm108_vm0, %v36_v14  ;;  %1466 = vmatprep.mubr.msk.f32.mxu1 %vm108_vm0, %v82_v16  ;;  %v63_v56 = vld [vmem:[%s2088_s0 + $0xf8] sm:$0xff]  ;;  %v64_v57 = vld [vmem:[%s2088_s0 + $0x100] sm:$0xff]  ;;  %v65_v58 = vld [vmem:[%s2088_s0 + $0x108] sm:$0xff]  ;;  %v762_v12 = vsub.s32 %v759_v10, %v761_v11 }
  0x14   :  { %v66_v59 = vld [vmem:[%s2088_s0 + $0x110] sm:$0xff]  ;;  %v67_v60 = vld [vmem:[%s2088_s0 + $0x118] sm:$0xff]  ;;  %v68_v61 = vld [vmem:[%s2088_s0 + $0x120] sm:$0xff] }
  0x15   :  { %v69_v62 = vld [vmem:[%s2088_s0 + $0x128] sm:$0xff]  ;;  %v70_v63 = vld [vmem:[%s2088_s0 + $0x130] sm:$0xff]  ;;  %v71_v0 = vld [vmem:[%s2088_s0 + $0x138] sm:$0xff] }
  0x16   :  { %1398 = vmatmul.mubr.msk.f32.gmra.mrb[4].mxu0 %vm108_vm0, %v37_v17  ;;  %1467 = vmatmul.mubr.msk.f32.gmra.mrb[4].mxu1 %vm108_vm0, %v83_v19  ;;  %v72_v1 = vld [vmem:[%s2088_s0 + $0x140] sm:$0xff]  ;;  %v73_v2 = vld [vmem:[%s2088_s0 + $0x148] sm:$0xff]  ;;  %v74_v3 = vld [vmem:[%s2088_s0 + $0x150] sm:$0xff] }
  0x17   :  { %1400 = vmatprep.mubr.msk.f32.mxu0 %vm108_vm0, %v38_v18  ;;  %1469 = vmatprep.mubr.msk.f32.mxu1 %vm108_vm0, %v84_v20  ;;  %v75_v4 = vld [vmem:[%s2088_s0 + $0x158] sm:$0xff]  ;;  %v76_v5 = vld [vmem:[%s2088_s0 + $0x160] sm:$0xff]  ;;  %v77_v6 = vld [vmem:[%s2088_s0 + $0x168] sm:$0xff] }
  0x18   :  { %v754_v13 = vld [vmem:[%s2089_s3] sm:$0xff] }
  0x19   :  { %v1925_v14 = vrot.slane %v754_v13, %v762_v12  ;;  %v756_v16 = vcombine.high %v754_v13, %v754_v13  ;;  %v1934_v18 = vld [vmem:[%s2090_s2] ss:$0 sm:$0xff] }
  0x1a   :  { %1401 = vmatmul.mubr.msk.f32.gmra.mrb[6].mxu0 %vm108_vm0, %v39_v21  ;;  %1470 = vmatmul.mubr.msk.f32.gmra.mrb[6].mxu1 %vm108_vm0, %v85_v23 }
  0x1b   :  { %1403 = vmatprep.mubr.msk.f32.mxu0 %vm108_vm0, %v40_v22  ;;  %1472 = vmatprep.mubr.msk.f32.mxu1 %vm108_vm0, %v86_v24  ;;  %v771_v15 = vcombine.high %v1925_v14, %v1925_v14  ;;  %v1929_v17 = vrot.slane %v756_v16, %v762_v12 }
  0x1e   :  { %1404 = vmatmul.mubr.msk.f32.gmra.mrb[8].mxu0 %vm108_vm0, %v41_v25  ;;  %1473 = vmatmul.mubr.msk.f32.gmra.mrb[8].mxu1 %vm108_vm0, %v87_v27 }
  0x1f   :  { %1406 = vmatprep.mubr.msk.f32.mxu0 %vm108_vm0, %v42_v26  ;;  %1475 = vmatprep.mubr.msk.f32.mxu1 %vm108_vm0, %v88_v28 }
  0x22   :  { %1407 = vmatmul.mubr.msk.f32.gmra.mrb[10].mxu0 %vm108_vm0, %v43_v29  ;;  %1476 = vmatmul.mubr.msk.f32.gmra.mrb[10].mxu1 %vm108_vm0, %v89_v31 }
  0x23   :  { %1409 = vmatprep.mubr.msk.f32.mxu0 %vm108_vm0, %v44_v30  ;;  %1478 = vmatprep.mubr.msk.f32.mxu1 %vm108_vm0, %v90_v32 }
  0x26   :  { %1410 = vmatmul.mubr.msk.f32.gmra.mrb[12].mxu0 %vm108_vm0, %v45_v33  ;;  %1479 = vmatmul.mubr.msk.f32.gmra.mrb[12].mxu1 %vm108_vm0, %v91_v35 }
  0x27   :  { %1412 = vmatprep.mubr.msk.f32.mxu0 %vm108_vm0, %v46_v34  ;;  %1481 = vmatprep.mubr.msk.f32.mxu1 %vm108_vm0, %v92_v36 }
  0x2a   :  { %1413 = vmatmul.mubr.msk.f32.gmra.mrb[14].mxu0 %vm108_vm0, %v47_v37  ;;  %1482 = vmatmul.mubr.msk.f32.gmra.mrb[14].mxu1 %vm108_vm0, %v93_v39 }
  0x2b   :  { %1415 = vmatprep.mubr.msk.f32.mxu0 %vm108_vm0, %v48_v38  ;;  %1484 = vmatprep.mubr.msk.f32.mxu1 %vm108_vm0, %v94_v40 }
  0x2e   :  { %1416 = vmatmul.mubr.msk.f32.gmra.mrb[16].mxu0 %vm108_vm0, %v49_v41  ;;  %1485 = vmatmul.mubr.msk.f32.gmra.mrb[16].mxu1 %vm108_vm0, %v95_v43 }
  0x2f   :  { %1418 = vmatprep.mubr.msk.f32.mxu0 %vm108_vm0, %v50_v42  ;;  %841 = vmatprep.mubr.f32.mxu1 %v771_v15 }
  0x32   :  { %1419 = vmatmul.mubr.msk.f32.gmra.mrb[18].mxu0 %vm108_vm0, %v51_v44 }
  0x33   :  { %1421 = vmatprep.mubr.msk.f32.mxu0 %vm108_vm0, %v52_v45 }
  0x36   :  { %1422 = vmatmul.mubr.msk.f32.gmra.mrb[20].mxu0 %vm108_vm0, %v53_v46 }
  0x37   :  { %1424 = vmatprep.mubr.msk.f32.mxu0 %vm108_vm0, %v54_v47 }
  0x3a   :  { %1425 = vmatmul.mubr.msk.f32.gmra.mrb[22].mxu0 %vm108_vm0, %v55_v48 }
  0x3b   :  { %1427 = vmatprep.mubr.msk.f32.mxu0 %vm108_vm0, %v56_v49 }
  0x3e   :  { %1428 = vmatmul.mubr.msk.f32.gmra.mrb[24].mxu0 %vm108_vm0, %v57_v50 }
  0x3f   :  { %1430 = vmatprep.mubr.msk.f32.mxu0 %vm108_vm0, %v58_v51 }
  0x42   :  { %1431 = vmatmul.mubr.msk.f32.gmra.mrb[26].mxu0 %vm108_vm0, %v59_v52 }
  0x43   :  { %1433 = vmatprep.mubr.msk.f32.mxu0 %vm108_vm0, %v60_v53 }
  0x46   :  { %1434 = vmatmul.mubr.msk.f32.gmra.mrb[28].mxu0 %vm108_vm0, %v61_v54 }
  0x47   :  { %1436 = vmatprep.mubr.msk.f32.mxu0 %vm108_vm0, %v62_v55 }
  0x4a   :  { %1437 = vmatmul.mubr.msk.f32.gmra.mrb[30].mxu0 %vm108_vm0, %v63_v56 }
  0x4b   :  { %1439 = vmatprep.mubr.msk.f32.mxu0 %vm108_vm0, %v64_v57 }
  0x4e   :  { %1440 = vmatmul.mubr.msk.f32.gmra.mrb[32].mxu0 %vm108_vm0, %v65_v58 }
  0x4f   :  { %1442 = vmatprep.mubr.msk.f32.mxu0 %vm108_vm0, %v66_v59 }
  0x52   :  { %1443 = vmatmul.mubr.msk.f32.gmra.mrb[34].mxu0 %vm108_vm0, %v67_v60 }
  0x53   :  { %1445 = vmatprep.mubr.msk.f32.mxu0 %vm108_vm0, %v68_v61 }
  0x56   :  { %1446 = vmatmul.mubr.msk.f32.gmra.mrb[36].mxu0 %vm108_vm0, %v69_v62 }
  0x57   :  { %1448 = vmatprep.mubr.msk.f32.mxu0 %vm108_vm0, %v70_v63 }
  0x5a   :  { %1449 = vmatmul.mubr.msk.f32.gmra.mrb[38].mxu0 %vm108_vm0, %v71_v0 }
  0x5b   :  { %1451 = vmatprep.mubr.msk.f32.mxu0 %vm108_vm0, %v72_v1 }
  0x5e   :  { %1452 = vmatmul.mubr.msk.f32.gmra.mrb[40].mxu0 %vm108_vm0, %v73_v2 }
  0x5f   :  { %1454 = vmatprep.mubr.msk.f32.mxu0 %vm108_vm0, %v74_v3 }
  0x62   :  { %1455 = vmatmul.mubr.msk.f32.gmra.mrb[42].mxu0 %vm108_vm0, %v75_v4 }
  0x63   :  { %1457 = vmatprep.mubr.msk.f32.mxu0 %vm108_vm0, %v76_v5 }
  0x66   :  { %1458 = vmatmul.mubr.msk.f32.gmra.mrb[44].mxu0 %vm108_vm0, %v77_v6 }
  0xe1   :  { %v1393_v19 = vpop.f32.mrb[0].mxu0  ;;  %v1462_v22 = vpop.f32.mrb[0].mxu1 }
  0xe2   :  { %v377_v20 = vadd.f32 %v1393_v19, %v1934_v18  ;;  %v371_v21 = vpop.f32.mrb[1].mxu0  ;;  %v607_v24 = vadd.f32 %v1462_v22, %v1934_v18  ;;  %v601_v25 = vpop.f32.mrb[1].mxu1 }
  0xe3   :  { %v372_v23 = vadd.f32 %v1934_v18, %v371_v21  ;;  %v602_v27 = vadd.f32 %v1934_v18, %v601_v25 }
  0xe4   :  { %v691_v26 = vmax.f32 %v377_v20, 0.0  ;;  %v737_v30 = vmax.f32 %v607_v24, 0.0 }
  0xe5   :  { %v690_v28 = vmax.f32 %v372_v23, 0.0  ;;  %v1396_v29 = vpop.f32.mrb[2].mxu0  ;;  %v736_v33 = vmax.f32 %v602_v27, 0.0  ;;  %v1465_v34 = vpop.f32.mrb[2].mxu1 }
  0xe6   :  { %v387_v31 = vadd.f32 %v1396_v29, %v1934_v18  ;;  %v381_v32 = vpop.f32.mrb[3].mxu0  ;;  %v617_v37 = vadd.f32 %v1465_v34, %v1934_v18  ;;  %v611_v38 = vpop.f32.mrb[3].mxu1 }
  0xe7   :  { %v1941_v35 = vpack.c.bf16 %v691_v26, %v690_v28  ;;  %v382_v36 = vadd.f32 %v1934_v18, %v381_v32  ;;  %v1945_v40 = vpack.c.bf16 %v737_v30, %v736_v33  ;;  %v612_v41 = vadd.f32 %v1934_v18, %v611_v38 }
  0xe8   :  { %v693_v39 = vmax.f32 %v387_v31, 0.0  ;;  %v739_v44 = vmax.f32 %v617_v37, 0.0 }
  0xe9   :  { %v692_v42 = vmax.f32 %v382_v36, 0.0  ;;  %v1399_v43 = vpop.f32.mrb[4].mxu0  ;;  %v738_v47 = vmax.f32 %v612_v41, 0.0  ;;  %v1468_v48 = vpop.f32.mrb[4].mxu1 }
  0xea   :  { %v397_v45 = vadd.f32 %v1399_v43, %v1934_v18  ;;  %v391_v46 = vpop.f32.mrb[5].mxu0  ;;  %v627_v51 = vadd.f32 %v1468_v48, %v1934_v18  ;;  %v621_v52 = vpop.f32.mrb[5].mxu1 }
  0xeb   :  { %v1949_v49 = vpack.c.bf16 %v693_v39, %v692_v42  ;;  %v392_v50 = vadd.f32 %v1934_v18, %v391_v46  ;;  %v1953_v54 = vpack.c.bf16 %v739_v44, %v738_v47  ;;  %v622_v55 = vadd.f32 %v1934_v18, %v621_v52 }
  0xec   :  { %v695_v53 = vmax.f32 %v397_v45, 0.0  ;;  %v741_v58 = vmax.f32 %v627_v51, 0.0 }
  0xed   :  { %v694_v56 = vmax.f32 %v392_v50, 0.0  ;;  %v1402_v57 = vpop.f32.mrb[6].mxu0  ;;  %v740_v61 = vmax.f32 %v622_v55, 0.0  ;;  %v1471_v62 = vpop.f32.mrb[6].mxu1 }
  0xee   :  { %v407_v59 = vadd.f32 %v1402_v57, %v1934_v18  ;;  %v401_v60 = vpop.f32.mrb[7].mxu0  ;;  %v637_v1 = vadd.f32 %v1471_v62, %v1934_v18  ;;  %v631_v2 = vpop.f32.mrb[7].mxu1 }
  0xef   :  { %v1957_v63 = vpack.c.bf16 %v695_v53, %v694_v56  ;;  %v402_v0 = vadd.f32 %v1934_v18, %v401_v60  ;;  %v1961_v4 = vpack.c.bf16 %v741_v58, %v740_v61  ;;  %v632_v5 = vadd.f32 %v1934_v18, %v631_v2 }
  0xf0   :  { %v697_v3 = vmax.f32 %v407_v59, 0.0  ;;  %v743_v8 = vmax.f32 %v637_v1, 0.0 }
  0xf1   :  { %v696_v6 = vmax.f32 %v402_v0, 0.0  ;;  %v1405_v7 = vpop.f32.mrb[8].mxu0  ;;  %v742_v11 = vmax.f32 %v632_v5, 0.0  ;;  %v1474_v12 = vpop.f32.mrb[8].mxu1 }
  0xf2   :  { %v417_v9 = vadd.f32 %v1405_v7, %v1934_v18  ;;  %v411_v10 = vpop.f32.mrb[9].mxu0  ;;  %v647_v16 = vadd.f32 %v1474_v12, %v1934_v18  ;;  %v641_v19 = vpop.f32.mrb[9].mxu1 }
  0xf3   :  { %v1965_v13 = vpack.c.bf16 %v697_v3, %v696_v6  ;;  %v412_v15 = vadd.f32 %v1934_v18, %v411_v10  ;;  %v1969_v21 = vpack.c.bf16 %v743_v8, %v742_v11  ;;  %v642_v22 = vadd.f32 %v1934_v18, %v641_v19 }
  0xf4   :  { %v699_v20 = vmax.f32 %v417_v9, 0.0  ;;  %v745_v25 = vmax.f32 %v647_v16, 0.0 }
  0xf5   :  { %v698_v23 = vmax.f32 %v412_v15, 0.0  ;;  %v1408_v24 = vpop.f32.mrb[10].mxu0  ;;  %v744_v28 = vmax.f32 %v642_v22, 0.0  ;;  %v1477_v29 = vpop.f32.mrb[10].mxu1 }
  0xf6   :  { %v427_v26 = vadd.f32 %v1408_v24, %v1934_v18  ;;  %v421_v27 = vpop.f32.mrb[11].mxu0  ;;  %v657_v32 = vadd.f32 %v1477_v29, %v1934_v18  ;;  %v651_v33 = vpop.f32.mrb[11].mxu1 }
  0xf7   :  { %v1973_v30 = vpack.c.bf16 %v699_v20, %v698_v23  ;;  %v422_v31 = vadd.f32 %v1934_v18, %v421_v27  ;;  %v1977_v36 = vpack.c.bf16 %v745_v25, %v744_v28  ;;  %v652_v37 = vadd.f32 %v1934_v18, %v651_v33 }
  0xf8   :  { %v701_v34 = vmax.f32 %v427_v26, 0.0  ;;  %v747_v41 = vmax.f32 %v657_v32, 0.0 }
  0xf9   :  { %v700_v38 = vmax.f32 %v422_v31, 0.0  ;;  %v1411_v39 = vpop.f32.mrb[12].mxu0  ;;  %v746_v44 = vmax.f32 %v652_v37, 0.0  ;;  %v1480_v45 = vpop.f32.mrb[12].mxu1 }
  0xfa   :  { %v437_v42 = vadd.f32 %v1411_v39, %v1934_v18  ;;  %v431_v43 = vpop.f32.mrb[13].mxu0  ;;  %v667_v48 = vadd.f32 %v1480_v45, %v1934_v18  ;;  %v661_v50 = vpop.f32.mrb[13].mxu1 }
  0xfb   :  { %v1981_v46 = vpack.c.bf16 %v701_v34, %v700_v38  ;;  %v432_v47 = vadd.f32 %v1934_v18, %v431_v43  ;;  %v1985_v52 = vpack.c.bf16 %v747_v41, %v746_v44  ;;  %v662_v53 = vadd.f32 %v1934_v18, %v661_v50 }
  0xfc   :  { %v703_v51 = vmax.f32 %v437_v42, 0.0  ;;  %v749_v57 = vmax.f32 %v667_v48, 0.0 }
  0xfd   :  { %v702_v55 = vmax.f32 %v432_v47, 0.0  ;;  %v1414_v56 = vpop.f32.mrb[14].mxu0  ;;  %v748_v60 = vmax.f32 %v662_v53, 0.0  ;;  %v1483_v61 = vpop.f32.mrb[14].mxu1 }
  0xfe   :  { %v447_v58 = vadd.f32 %v1414_v56, %v1934_v18  ;;  %v441_v59 = vpop.f32.mrb[15].mxu0  ;;  %v677_v1 = vadd.f32 %v1483_v61, %v1934_v18  ;;  %v671_v2 = vpop.f32.mrb[15].mxu1 }
  0xff   :  { %v1989_v62 = vpack.c.bf16 %v703_v51, %v702_v55  ;;  %v442_v0 = vadd.f32 %v1934_v18, %v441_v59  ;;  %v1993_v5 = vpack.c.bf16 %v749_v57, %v748_v60  ;;  %v672_v6 = vadd.f32 %v1934_v18, %v671_v2 }
 0x100   :  { %v705_v3 = vmax.f32 %v447_v58, 0.0  ;;  %v751_v9 = vmax.f32 %v677_v1, 0.0 }
 0x101   :  { %v704_v7 = vmax.f32 %v442_v0, 0.0  ;;  %v1417_v8 = vpop.f32.mrb[16].mxu0  ;;  %v750_v12 = vmax.f32 %v672_v6, 0.0  ;;  %v1486_v15 = vpop.f32.mrb[16].mxu1 }
 0x102   :  { %v457_v10 = vadd.f32 %v1417_v8, %v1934_v18  ;;  %v451_v11 = vpop.f32.mrb[17].mxu0  ;;  %v687_v20 = vadd.f32 %v1486_v15, %v1934_v18  ;;  %v681_v22 = vpop.f32.mrb[17].mxu1 }
 0x103   :  { %v1997_v16 = vpack.c.bf16 %v705_v3, %v704_v7  ;;  %v452_v19 = vadd.f32 %v1934_v18, %v451_v11  ;;  %v2001_v24 = vpack.c.bf16 %v751_v9, %v750_v12  ;;  %v682_v25 = vadd.f32 %v1934_v18, %v681_v22 }
 0x104   :  { %v707_v23 = vmax.f32 %v457_v10, 0.0  ;;  %v753_v28 = vmax.f32 %v687_v20, 0.0 }
 0x105   :  { %v706_v26 = vmax.f32 %v452_v19, 0.0  ;;  %v1420_v27 = vpop.f32.mrb[18].mxu0  ;;  %v752_v32 = vmax.f32 %v682_v25, 0.0 }
 0x106   :  { %v467_v29 = vadd.f32 %v1420_v27, %v1934_v18  ;;  %v461_v31 = vpop.f32.mrb[19].mxu0 }
 0x107   :  { %v1516_v33 = vpack.c.bf16 %v707_v23, %v706_v26  ;;  %v462_v34 = vadd.f32 %v1934_v18, %v461_v31  ;;  %v2006_v38 = vpack.c.bf16 %v753_v28, %v752_v32 }
 0x108   :  { %v709_v37 = vmax.f32 %v467_v29, 0.0 }
 0x109   :  { %v708_v39 = vmax.f32 %v462_v34, 0.0  ;;  %v1423_v41 = vpop.f32.mrb[20].mxu0  ;;  %1517 = vmatprep.subr.bf16.mxu1 %v1516_v33 }
 0x10a   :  { %v477_v42 = vadd.f32 %v1423_v41, %v1934_v18  ;;  %v471_v43 = vpop.f32.mrb[21].mxu0  ;;  %1519 = vmatpush3.bf16.msra.mxu1 %v1941_v35 }
 0x10b   :  { %v1520_v44 = vpack.c.bf16 %v709_v37, %v708_v39  ;;  %v472_v45 = vadd.f32 %v1934_v18, %v471_v43  ;;  %v772_v43 = vcombine.high %v1929_v17, %v1929_v17 }
 0x10c   :  { %v711_v47 = vmax.f32 %v477_v42, 0.0 }
 0x10d   :  { %v710_v48 = vmax.f32 %v472_v45, 0.0  ;;  %v1426_v50 = vpop.f32.mrb[22].mxu0  ;;  %1521 = vmatprep.subr.bf16.mxu1 %v1520_v44 }
 0x10e   :  { %v487_v51 = vadd.f32 %v1426_v50, %v1934_v18  ;;  %v481_v53 = vpop.f32.mrb[23].mxu0  ;;  %1523 = vmatpush3.bf16.msra.mxu1 %v1949_v49 }
 0x10f   :  { %v1524_v55 = vpack.c.bf16 %v711_v47, %v710_v48  ;;  %v482_v56 = vadd.f32 %v1934_v18, %v481_v53 }
 0x110   :  { %v713_v57 = vmax.f32 %v487_v51, 0.0 }
 0x111   :  { %v712_v58 = vmax.f32 %v482_v56, 0.0  ;;  %v1429_v59 = vpop.f32.mrb[24].mxu0  ;;  %1525 = vmatprep.subr.bf16.mxu1 %v1524_v55 }
 0x112   :  { %v497_v35 = vadd.f32 %v1429_v59, %v1934_v18  ;;  %v491_v60 = vpop.f32.mrb[25].mxu0  ;;  %1527 = vmatpush3.bf16.msra.mxu1 %v1957_v63 }
 0x113   :  { %v1528_v61 = vpack.c.bf16 %v713_v57, %v712_v58  ;;  %v492_v0 = vadd.f32 %v1934_v18, %v491_v60 }
 0x114   :  { %v715_v1 = vmax.f32 %v497_v35, 0.0 }
 0x115   :  { %v714_v2 = vmax.f32 %v492_v0, 0.0  ;;  %v1432_v3 = vpop.f32.mrb[26].mxu0  ;;  %1529 = vmatprep.subr.bf16.mxu1 %v1528_v61 }
 0x116   :  { %v507_v49 = vadd.f32 %v1432_v3, %v1934_v18  ;;  %v501_v6 = vpop.f32.mrb[27].mxu0  ;;  %1531 = vmatpush3.bf16.msra.mxu1 %v1965_v13 }
 0x117   :  { %v1532_v7 = vpack.c.bf16 %v715_v1, %v714_v2  ;;  %v502_v8 = vadd.f32 %v1934_v18, %v501_v6 }
 0x118   :  { %v717_v9 = vmax.f32 %v507_v49, 0.0 }
 0x119   :  { %v716_v10 = vmax.f32 %v502_v8, 0.0  ;;  %v1435_v11 = vpop.f32.mrb[28].mxu0  ;;  %1533 = vmatprep.subr.bf16.mxu1 %v1532_v7 }
 0x11a   :  { %v517_v63 = vadd.f32 %v1435_v11, %v1934_v18  ;;  %v511_v12 = vpop.f32.mrb[29].mxu0  ;;  %1535 = vmatpush3.bf16.msra.mxu1 %v1973_v30 }
 0x11b   :  { %v1536_v15 = vpack.c.bf16 %v717_v9, %v716_v10  ;;  %v512_v19 = vadd.f32 %v1934_v18, %v511_v12 }
 0x11c   :  { %v719_v20 = vmax.f32 %v517_v63, 0.0 }
 0x11d   :  { %v718_v22 = vmax.f32 %v512_v19, 0.0  ;;  %v1438_v23 = vpop.f32.mrb[30].mxu0  ;;  %1537 = vmatprep.subr.bf16.mxu1 %v1536_v15 }
 0x11e   :  { %v527_v13 = vadd.f32 %v1438_v23, %v1934_v18  ;;  %v521_v25 = vpop.f32.mrb[31].mxu0  ;;  %1539 = vmatpush3.bf16.msra.mxu1 %v1981_v46 }
 0x11f   :  { %v1540_v26 = vpack.c.bf16 %v719_v20, %v718_v22  ;;  %v522_v27 = vadd.f32 %v1934_v18, %v521_v25 }
 0x120   :  { %v721_v28 = vmax.f32 %v527_v13, 0.0 }
 0x121   :  { %v720_v29 = vmax.f32 %v522_v27, 0.0  ;;  %1541 = vmatprep.subr.bf16.mxu1 %v1540_v26  ;;  %v1441_v31 = vpop.f32.mrb[32].mxu0 }
 0x122   :  { %v537_v30 = vadd.f32 %v1441_v31, %v1934_v18  ;;  %1543 = vmatpush3.bf16.msra.mxu1 %v1989_v62  ;;  %v531_v32 = vpop.f32.mrb[33].mxu0  ;;  %v1003_v31 = vld [vmem:[%s2092_s7 + $0x10] sm:$0xff] }
 0x123   :  { %v1544_v33 = vpack.c.bf16 %v721_v28, %v720_v29  ;;  %v532_v34 = vadd.f32 %v1934_v18, %v531_v32 }
 0x124   :  { %v723_v37 = vmax.f32 %v537_v30, 0.0  ;;  %v1004_v30 = vld [vmem:[%s2092_s7 + $0x18] sm:$0xff] }
 0x125   :  { %v722_v39 = vmax.f32 %v532_v34, 0.0  ;;  %1545 = vmatprep.subr.bf16.mxu1 %v1544_v33  ;;  %v1444_v41 = vpop.f32.mrb[34].mxu0  ;;  %v1584_v32 = vpack.c.bf16 %v1004_v30, %v1003_v31  ;;  %v1228_v33 = vld [vmem:[%s2093_s5] ss:$0 sm:$0xff] }
 0x126   :  { %v547_v46 = vadd.f32 %v1444_v41, %v1934_v18  ;;  %1547 = vmatpush3.bf16.msra.mxu1 %v1997_v16  ;;  %v541_v42 = vpop.f32.mrb[35].mxu0 }
 0x127   :  { %v1550_v44 = vpack.c.bf16 %v723_v37, %v722_v39  ;;  %v542_v45 = vadd.f32 %v1934_v18, %v541_v42  ;;  %1549 = vmatprep.subr.bf16.mxu1 %v1953_v54 }
 0x128   :  { %v725_v62 = vmax.f32 %v547_v46, 0.0  ;;  %v1000_v46 = vld [vmem:[%s2094_s6] sm:$0xff] }
 0x129   :  { %v724_v47 = vmax.f32 %v542_v45, 0.0  ;;  %v1447_v48 = vpop.f32.mrb[36].mxu0  ;;  %842 = vmatmul.mubr.f32.vlgmr.msra.gmra.mrb[18].mxu1 %v1925_v14  ;;  %v1232_v45 = vld [vmem:[%s2095_s8] ss:$0 sm:$0xff] }
 0x12a   :  { %v557_v50 = vadd.f32 %v1447_v48, %v1934_v18  ;;  %1551 = vmatpush3.bf16.msra.mxu1 %v1550_v44  ;;  %v551_v51 = vpop.f32.mrb[37].mxu0  ;;  %911 = vmatprep.mubr.f32.mxu1 %v772_v43 }
 0x12b   :  { %v1554_v16 = vpack.c.bf16 %v725_v62, %v724_v47  ;;  %v552_v53 = vadd.f32 %v1934_v18, %v551_v51  ;;  %1553 = vmatprep.subr.bf16.mxu1 %v1961_v4 }
 0x12c   :  { %v727_v55 = vmax.f32 %v557_v50, 0.0 }
 0x12d   :  { %v726_v56 = vmax.f32 %v552_v53, 0.0  ;;  %v1450_v57 = vpop.f32.mrb[38].mxu0 }
 0x12e   :  { %v567_v54 = vadd.f32 %v1450_v57, %v1934_v18  ;;  %1555 = vmatpush3.bf16.msra.mxu1 %v1554_v16  ;;  %v561_v58 = vpop.f32.mrb[39].mxu0 }
 0x12f   :  { %v1558_v59 = vpack.c.bf16 %v727_v55, %v726_v56  ;;  %v562_v14 = vadd.f32 %v1934_v18, %v561_v58  ;;  %1557 = vmatprep.subr.bf16.mxu1 %v1969_v21 }
 0x130   :  { %v729_v35 = vmax.f32 %v567_v54, 0.0 }
 0x131   :  { %v728_v60 = vmax.f32 %v562_v14, 0.0  ;;  %v1453_v61 = vpop.f32.mrb[40].mxu0 }
 0x132   :  { %v577_v0 = vadd.f32 %v1453_v61, %v1934_v18  ;;  %1559 = vmatpush3.bf16.msra.mxu1 %v1558_v59  ;;  %v571_v1 = vpop.f32.mrb[41].mxu0 }
 0x133   :  { %v1562_v4 = vpack.c.bf16 %v729_v35, %v728_v60  ;;  %v572_v2 = vadd.f32 %v1934_v18, %v571_v1  ;;  %1561 = vmatprep.subr.bf16.mxu1 %v1977_v36 }
 0x134   :  { %v731_v3 = vmax.f32 %v577_v0, 0.0 }
 0x135   :  { %v730_v49 = vmax.f32 %v572_v2, 0.0  ;;  %v1456_v6 = vpop.f32.mrb[42].mxu0 }
 0x136   :  { %v587_v7 = vadd.f32 %v1456_v6, %v1934_v18  ;;  %1563 = vmatpush3.bf16.msra.mxu1 %v1562_v4  ;;  %v581_v8 = vpop.f32.mrb[43].mxu0 }
 0x137   :  { %v1566_v21 = vpack.c.bf16 %v731_v3, %v730_v49  ;;  %v582_v9 = vadd.f32 %v1934_v18, %v581_v8  ;;  %1565 = vmatprep.subr.bf16.mxu1 %v1985_v52  ;;  %v1598_v52 = vmov 0.0  }
 0x138   :  { %v733_v10 = vmax.f32 %v587_v7, 0.0 }
 0x139   :  { %v732_v11 = vmax.f32 %v582_v9, 0.0  ;;  %v1459_v63 = vpop.f32.mrb[44].mxu0 }
 0x13a   :  { %v597_v12 = vadd.f32 %v1459_v63, %v1934_v18  ;;  %1567 = vmatpush3.bf16.msra.mxu1 %v1566_v21  ;;  %v591_v15 = vpop.f32.mrb[45].mxu0 }
 0x13b   :  { %v1570_v36 = vpack.c.bf16 %v733_v10, %v732_v11  ;;  %v592_v19 = vadd.f32 %v1934_v18, %v591_v15  ;;  %1569 = vmatprep.subr.bf16.mxu1 %v1993_v5  ;;  %v917_v18 = vld [vmem:[%s2091_s4] sm:$0xff]  ;;  %v1600_v5 = vmov 0.0|0.0  }
 0x13c   :  { %v735_v20 = vmax.f32 %v597_v12, 0.0 }
 0x13d   :  { %v734_v22 = vmax.f32 %v592_v19, 0.0 }
 0x13e   :  { %1571 = vmatpush3.bf16.msra.mxu1 %v1570_v36 }
 0x13f   :  { %v1574_v23 = vpack.c.bf16 %v735_v20, %v734_v22  ;;  %1573 = vmatprep.subr.bf16.mxu1 %v2001_v24 }
 0x142   :  { %1575 = vmatpush3.bf16.msra.mxu1 %v1574_v23 }
 0x143   :  { %1577 = vmatprep.subr.bf16.mxu1 %v2006_v38 }
 0x146   :  { %1579 = vmatpush3.bf16.msra.mxu1 %v1945_v40  ;;  %v1002_v40 = vld [vmem:[%s2092_s7 + $0x8] sm:$0xff] }
 0x147   :  { %1487 = vmatprep.subr.mxu1 %v1598_v52 }
 0x149   :  { %912 = vmatmul.mubr.f32.vlgmr.msra.gmra.mrb[20].mxu1 %v1929_v17  ;;  %v1001_v17 = vld [vmem:[%s2092_s7] sm:$0xff] }
 0x14a   :  { %1488 = vmatpush3.msra.mxu1 %v917_v18  ;;  %1489 = vmatprep.mubr.msk.f32.mxu1 %vm1599_vm2, %v1598_v52  ;;  %v1581_v28 = vpack.c.bf16 %v1002_v40, %v1001_v17 }
 0x14b   :  { %1580 = vmatprep.subr.bf16.mxu1 %v1600_v5 }
 0x1fc   :  { %v1334_v24 = vpop.f32.mrb[18].mxu1 }
 0x1fd   :  { %v1335_v13 = vpop.f32.mrb[19].mxu1 }
 0x1fe   :  { %v1336_v25 = vadd.f32 %v1335_v13, %v1334_v24 }
 0x21c   :  { %v1369_v38 = vpop.f32.mrb[20].mxu1 }
 0x21d   :  { %v1370_v26 = vpop.f32.mrb[21].mxu1 }
 0x21e   :  { %v1371_v27 = vadd.f32 %v1370_v26, %v1369_v38 }
 0x220   :  { %v914_v29 = vadd.f32 %v1371_v27, %v1336_v25 }
 0x222   :  { %1490 = vmatmul.mubr.msk.f32.vlgmr.msra.gmra.mrb[22].mxu1 %vm925_vm3, %v914_v29 }
 0x223   :  { %1582 = vmatpush3.bf16.msra.mxu1 %v1581_v28  ;;  %1500 = vmatprep.mubr.msk.f32.mxu1 %vm1599_vm2, %v1598_v52 }
 0x224   :  { %1583 = vmatprep.subr.bf16.mxu1 %v1600_v5 }
 0x227   :  { %1585 = vmatpush3.bf16.msra.mxu1 %v1584_v32 }
 0x228   :  { %1503 = vmatprep.subr.mxu1 %v1598_v52 }
 0x2f5   :  { %v995_v34 = vpop.f32.mrb[22].mxu1 }
 0x2f6   :  { %v996_v37 = vadd.f32 %v1228_v33, %v995_v34  ;;  %v1491_v39 = vpop.f32.mrb[23].mxu1 }
 0x2f8   :  { %v999_v41 = vmax.f32 %v996_v37, 0.0 }
 0x2fa   :  { %1501 = vmatmul.mubr.msk.f32.vlgmr.msra.gmra.mrb[24].mxu1 %vm1005_vm4, %v999_v41 }
 0x2fb   :  { %1504 = vmatpush3.msra.mxu1 %v1000_v46  ;;  %1505 = vmatprep.mubr.msk.f32.mxu1 %vm1599_vm2, %v1598_v52 }
 0x2fe   :  { %1506 = vmatmul.mubr.msk.f32.vlgmr.msra.gmra.mrb[26].mxu1 %vm925_vm3, %v914_v29 }
 0x3cd   :  { %v1075_v42 = vpop.f32.mrb[24].mxu1 }
 0x3ce   :  { %v1502_v43 = vpop.f32.mrb[25].mxu1 }
 0x3d1   :  { %v1145_v44 = vpop.f32.mrb[26].mxu1 }
 0x3d2   :  { %v1146_v62 = vadd.f32 %v1145_v44, %v1075_v42  ;;  %v1507_v47 = vpop.f32.mrb[27].mxu1 }
 0x3d4   :  { %v1156_v48 = vadd.f32 %v1232_v45, %v1146_v62 }
 0x3d6   :  { %1157 = vst [vmem:[%s2096_s9] sm:$0x3] %v1156_v48 }

</bundles_post_ra>
